<compile_context>
chip_gen: v7x
topology: tpu7x:2x2x1
jax: 0.10.0
libtpu: 0.0.40
codegen_flags: <defaults>
</compile_context>

<pallas_src>
import jax
import jax.numpy as jnp
from jax.experimental import pallas as pl
from jax.experimental.pallas import tpu as pltpu


def _round_up(x, m):
    return ((x + m - 1) // m) * m


def _latent_variation_kernel(q_ref, a_ref, wq_ref, wa_ref, b_ref, eps_ref,
                             z_ref, mean_ref, logvar_ref):
    # Fused two-head linear: [mean | logvar] = q @ W_q + a @ W_a + b   (f32 MXU accum).
    ml = (
        jnp.dot(q_ref[...], wq_ref[...], preferred_element_type=jnp.float32)
        + jnp.dot(a_ref[...], wa_ref[...], preferred_element_type=jnp.float32)
        + b_ref[...]
    )
    z_hid = mean_ref.shape[1]
    mean = ml[:, :z_hid]
    logvar = ml[:, z_hid:]
    # Direct per-output stores (no in-kernel concatenate, no extra VMEM temp).
    mean_ref[...] = mean
    logvar_ref[...] = logvar
    # Reparameterization: z = eps * exp(0.5 * logvar) + mean  (EUP exp + VPU fma).
    z_ref[...] = eps_ref[...] * jnp.exp(0.5 * logvar) + mean


def fuse_latent_variation_params(w_mean, b_mean, w_logvar, b_logvar, half_q):
    """Do the weight fusion ONCE at parameter-init time (not per forward call).

    w_mean / w_logvar: [rnn_hid, z_hid] (already transposed from nn.Linear layout).
    Returns (w_q [half_q, 2Z], w_a [rnn_hid - half_q, 2Z], b_fused [1, 2Z]).
    """
    w_fused = jnp.concatenate([w_mean, w_logvar], axis=1)            # [H, 2Z]
    b_fused = jnp.concatenate([b_mean, b_logvar], axis=0).reshape(1, -1)
    return w_fused[:half_q], w_fused[half_q:], b_fused


def latent_variation(q, a, w_q, w_a, b_fused, eps, *, block_b=512):
    """Forward pass with pre-fused parameters.

    q: [B, Hq]; a: [B, Ha]; w_q: [Hq, 2Z]; w_a: [Ha, 2Z]; b_fused: [1, 2Z]; eps: [B, Z].
    Returns (z, mean, logvar), each [B, Z] float32.
    """
    batch, half_q = q.shape
    _, half_a = a.shape
    two_z = w_q.shape[1]
    z_hid = two_z // 2
    assert w_q.shape == (half_q, two_z) and w_a.shape == (half_a, two_z)
    assert b_fused.shape == (1, two_z)
    assert eps.shape == (batch, z_hid)

    # Batch tile: multiple of 8 sublanes, capped (a) by block_b so VMEM use is
    # batch-independent and (b) so the grid has >= 2 steps when possible, letting
    # v7x shard the batch across its two TensorCores via "parallel" semantics.
    tb = min(block_b, _round_up(batch, 8), _round_up(pl.cdiv(batch, 2), 8))
    grid = (pl.cdiv(batch, tb),)

    # VMEM budget: resident weights (assume up to 2 buffers in the fallback path)
    # + double-buffered q/a/eps input tiles + double-buffered z/mean/logvar output tiles.
    itemsize = 4
    weight_bytes = 2 * ((half_q + half_a) * two_z + two_z) * itemsize
    stream_bytes = 2 * tb * (half_q + half_a + z_hid + 3 * z_hid) * itemsize
    vmem_limit = max(int(1.25 * (weight_bytes + stream_bytes)) + (1 << 20), 16 << 20)
    vmem_limit = min(vmem_limit, 48 << 20)   # fits v7x's 64 MiB physical with headroom

    compiler_params = pltpu.CompilerParams(
        dimension_semantics=("parallel",),
        vmem_limit_bytes=vmem_limit,
    )

    out_shape = tuple(
        jax.ShapeDtypeStruct((batch, z_hid), jnp.float32) for _ in range(3)
    )

    def build(weight_pipeline_mode):
        row_spec = lambda width: pl.BlockSpec((tb, width), lambda i: (i, 0))
        if weight_pipeline_mode is None:
            const_spec = lambda shape: pl.BlockSpec(shape, lambda i: (0, 0))
        else:
            const_spec = lambda shape: pl.BlockSpec(
                shape, lambda i: (0, 0), pipeline_mode=weight_pipeline_mode
            )
        return pl.pallas_call(
            _latent_variation_kernel,
            out_shape=out_shape,
            grid=grid,
            in_specs=[
                row_spec(half_q),              # q      (tiled over batch)
                row_spec(half_a),              # a      (tiled over batch)
                const_spec((half_q, two_z)),   # W_q    (resident across grid)
                const_spec((half_a, two_z)),   # W_a    (resident across grid)
                const_spec((1, two_z)),        # fused bias
                row_spec(z_hid),               # eps    (tiled over batch)
            ],
            out_specs=tuple(
                pl.BlockSpec((tb, z_hid), lambda i: (i, 0)) for _ in range(3)
            ),
            compiler_params=compiler_params,
        )

    try:
        # Single-buffer the resident weights/bias (constant index_map -> DMA'd once;
        # halves the dominant weight VMEM term, which matters most on v7x's 64 MiB).
        return build(pl.Buffered(1))(q, a, w_q, w_a, b_fused, eps)
    except Exception:
        # Fallback: default double-buffered specs (always supported).
        return build(None)(q, a, w_q, w_a, b_fused, eps)


if __name__ == "__main__":
    # Small shapes consistent with the module:
    #   q, a: [batch, rnn_hid_size // 2]; rnn_hid_size = 32; z_hid_size = 32.
    batch = 8
    half = 16
    rnn_hid_size = 2 * half
    z_hid_size = 32

    key = jax.random.PRNGKey(0)
    kq, ka, kwm, kbm, kwl, kbl, keps = jax.random.split(key, 7)

    q = jax.random.normal(kq, (batch, half), dtype=jnp.float32)
    a = jax.random.normal(ka, (batch, half), dtype=jnp.float32)

    # Deterministic parameter init (uniform(-bound, bound), like nn.Linear default).
    # Weights are stored pre-transposed: [rnn_hid, z_hid].
    bound = 1.0 / jnp.sqrt(rnn_hid_size)
    w_mean = jax.random.uniform(kwm, (rnn_hid_size, z_hid_size), jnp.float32, -bound, bound)
    b_mean = jax.random.uniform(kbm, (z_hid_size,), jnp.float32, -bound, bound)
    w_logvar = jax.random.uniform(kwl, (rnn_hid_size, z_hid_size), jnp.float32, -bound, bound)
    b_logvar = jax.random.uniform(kbl, (z_hid_size,), jnp.float32, -bound, bound)

    # torch.randn equivalent: standard-normal noise for the reparameterization trick.
    eps = jax.random.normal(keps, (batch, z_hid_size), dtype=jnp.float32)

    # Weight fusion happens ONCE here (parameter-init time), not per forward call.
    w_q, w_a, b_fused = fuse_latent_variation_params(w_mean, b_mean, w_logvar, b_logvar, half)
    w_q, w_a, b_fused = jax.block_until_ready((w_q, w_a, b_fused))

    z, mean, logvar = latent_variation(q, a, w_q, w_a, b_fused, eps)
    jax.block_until_ready((z, mean, logvar))

    # Reference check in plain JAX.
    ctx = jnp.concatenate([q, a], axis=1)
    mean_ref = ctx @ w_mean + b_mean
    logvar_ref = ctx @ w_logvar + b_logvar
    z_ref = eps * jnp.exp(0.5 * logvar_ref) + mean_ref
    assert jnp.allclose(mean, mean_ref, atol=1e-5)
    assert jnp.allclose(logvar, logvar_ref, atol=1e-5)
    assert jnp.allclose(z, z_ref, atol=1e-5)

    print("KERNEL_OK")
</pallas_src>

<mosaic_0001>
module attributes {stable_mosaic.version = 11 : i64} {
  func.func @_latent_variation_kernel(%arg0: i32, %arg1: memref<8x16xf32, #tpu.memory_space<vmem>>, %arg2: memref<8x16xf32, #tpu.memory_space<vmem>>, %arg3: memref<16x64xf32, #tpu.memory_space<vmem>>, %arg4: memref<16x64xf32, #tpu.memory_space<vmem>>, %arg5: memref<1x64xf32, #tpu.memory_space<vmem>>, %arg6: memref<8x32xf32, #tpu.memory_space<vmem>>, %arg7: memref<8x32xf32, #tpu.memory_space<vmem>>, %arg8: memref<8x32xf32, #tpu.memory_space<vmem>>, %arg9: memref<8x32xf32, #tpu.memory_space<vmem>>) attributes {dimension_semantics = [#tpu.dimension_semantics<parallel>], iteration_bounds = array<i64: 1>, scalar_prefetch = 0 : i64, scratch_operands = 0 : i64, tpu.core_type = #tpu.core_type<tc>, window_params = [{transform_indices = @transform_0, window_bounds = array<i64: 8, 16>}, {transform_indices = @transform_1, window_bounds = array<i64: 8, 16>}, {pipeline_mode = #tpu.pipeline_mode<synchronous>, transform_indices = @transform_2, window_bounds = array<i64: 16, 64>}, {pipeline_mode = #tpu.pipeline_mode<synchronous>, transform_indices = @transform_3, window_bounds = array<i64: 16, 64>}, {pipeline_mode = #tpu.pipeline_mode<synchronous>, transform_indices = @transform_4, window_bounds = array<i64: 1, 64>}, {transform_indices = @transform_5, window_bounds = array<i64: 8, 32>}, {transform_indices = @transform_6, window_bounds = array<i64: 8, 32>}, {transform_indices = @transform_7, window_bounds = array<i64: 8, 32>}, {transform_indices = @transform_8, window_bounds = array<i64: 8, 32>}]} {
    %c0 = arith.constant 0 : index
    %c0_0 = arith.constant 0 : index
    %0 = vector.load %arg1[%c0, %c0_0] : memref<8x16xf32, #tpu.memory_space<vmem>>, vector<8x16xf32>
    %c0_1 = arith.constant 0 : index
    %c0_2 = arith.constant 0 : index
    %1 = vector.load %arg3[%c0_1, %c0_2] : memref<16x64xf32, #tpu.memory_space<vmem>>, vector<16x64xf32>
    %cst = arith.constant dense<0.000000e+00> : vector<8x64xf32>
    %2 = tpu.matmul %0, %1, %cst {dimension_numbers = #tpu.dot_dimension_numbers<[1], [0], [0], [1], [0, 0, 1, 1], [], []>} : vector<8x16xf32>, vector<16x64xf32>, vector<8x64xf32> -> vector<8x64xf32>
    %c0_3 = arith.constant 0 : index
    %c0_4 = arith.constant 0 : index
    %3 = vector.load %arg2[%c0_3, %c0_4] : memref<8x16xf32, #tpu.memory_space<vmem>>, vector<8x16xf32>
    %c0_5 = arith.constant 0 : index
    %c0_6 = arith.constant 0 : index
    %4 = vector.load %arg4[%c0_5, %c0_6] : memref<16x64xf32, #tpu.memory_space<vmem>>, vector<16x64xf32>
    %cst_7 = arith.constant dense<0.000000e+00> : vector<8x64xf32>
    %5 = tpu.matmul %3, %4, %cst_7 {dimension_numbers = #tpu.dot_dimension_numbers<[1], [0], [0], [1], [0, 0, 1, 1], [], []>} : vector<8x16xf32>, vector<16x64xf32>, vector<8x64xf32> -> vector<8x64xf32>
    %6 = arith.addf %2, %5 : vector<8x64xf32>
    %c0_8 = arith.constant 0 : index
    %c0_9 = arith.constant 0 : index
    %7 = vector.load %arg5[%c0_8, %c0_9] : memref<1x64xf32, #tpu.memory_space<vmem>>, vector<1x64xf32>
    %8 = vector.broadcast %7 : vector<1x64xf32> to vector<8x64xf32>
    %9 = arith.addf %6, %8 : vector<8x64xf32>
    %10 = vector.extract_strided_slice %9 {offsets = [0, 0], sizes = [8, 32], strides = [1, 1]} : vector<8x64xf32> to vector<8x32xf32>
    %11 = vector.extract_strided_slice %9 {offsets = [0, 32], sizes = [8, 32], strides = [1, 1]} : vector<8x64xf32> to vector<8x32xf32>
    %c0_10 = arith.constant 0 : index
    %c0_11 = arith.constant 0 : index
    %12 = vector.load %arg8[%c0_10, %c0_11] : memref<8x32xf32, #tpu.memory_space<vmem>>, vector<8x32xf32>
    tpu.vector_store %arg8[%c0_10, %c0_11], %10 {strides = array<i32>} : memref<8x32xf32, #tpu.memory_space<vmem>>, vector<8x32xf32>,
    %c0_12 = arith.constant 0 : index
    %c0_13 = arith.constant 0 : index
    %13 = vector.load %arg9[%c0_12, %c0_13] : memref<8x32xf32, #tpu.memory_space<vmem>>, vector<8x32xf32>
    tpu.vector_store %arg9[%c0_12, %c0_13], %11 {strides = array<i32>} : memref<8x32xf32, #tpu.memory_space<vmem>>, vector<8x32xf32>,
    %c0_14 = arith.constant 0 : index
    %c0_15 = arith.constant 0 : index
    %14 = vector.load %arg6[%c0_14, %c0_15] : memref<8x32xf32, #tpu.memory_space<vmem>>, vector<8x32xf32>
    %cst_16 = arith.constant 5.000000e-01 : f32
    %15 = vector.broadcast %cst_16 : f32 to vector<8x32xf32>
    %16 = arith.mulf %15, %11 : vector<8x32xf32>
    %17 = math.exp %16 : vector<8x32xf32>
    %18 = arith.mulf %14, %17 : vector<8x32xf32>
    %19 = arith.addf %18, %10 : vector<8x32xf32>
    %c0_17 = arith.constant 0 : index
    %c0_18 = arith.constant 0 : index
    %20 = vector.load %arg7[%c0_17, %c0_18] : memref<8x32xf32, #tpu.memory_space<vmem>>, vector<8x32xf32>
    tpu.vector_store %arg7[%c0_17, %c0_18], %19 {strides = array<i32>} : memref<8x32xf32, #tpu.memory_space<vmem>>, vector<8x32xf32>,
    return
  }
  func.func @transform_0(%arg0: i32) -> (i32, i32) {
    %c0_i32 = arith.constant 0 : i32
    %c0_i32_0 = arith.constant 0 : i32
    return %arg0, %c0_i32 : i32, i32
  }
  func.func @transform_1(%arg0: i32) -> (i32, i32) {
    %c0_i32 = arith.constant 0 : i32
    %c0_i32_0 = arith.constant 0 : i32
    return %arg0, %c0_i32 : i32, i32
  }
  func.func @transform_2(%arg0: i32) -> (i32, i32) {
    %c0_i32 = arith.constant 0 : i32
    %c0_i32_0 = arith.constant 0 : i32
    %c0_i32_1 = arith.constant 0 : i32
    return %c0_i32, %c0_i32_0 : i32, i32
  }
  func.func @transform_3(%arg0: i32) -> (i32, i32) {
    %c0_i32 = arith.constant 0 : i32
    %c0_i32_0 = arith.constant 0 : i32
    %c0_i32_1 = arith.constant 0 : i32
    return %c0_i32, %c0_i32_0 : i32, i32
  }
  func.func @transform_4(%arg0: i32) -> (i32, i32) {
    %c0_i32 = arith.constant 0 : i32
    %c0_i32_0 = arith.constant 0 : i32
    %c0_i32_1 = arith.constant 0 : i32
    return %c0_i32, %c0_i32_0 : i32, i32
  }
  func.func @transform_5(%arg0: i32) -> (i32, i32) {
    %c0_i32 = arith.constant 0 : i32
    %c0_i32_0 = arith.constant 0 : i32
    return %arg0, %c0_i32 : i32, i32
  }
  func.func @transform_6(%arg0: i32) -> (i32, i32) {
    %c0_i32 = arith.constant 0 : i32
    %c0_i32_0 = arith.constant 0 : i32
    return %arg0, %c0_i32 : i32, i32
  }
  func.func @transform_7(%arg0: i32) -> (i32, i32) {
    %c0_i32 = arith.constant 0 : i32
    %c0_i32_0 = arith.constant 0 : i32
    return %arg0, %c0_i32 : i32, i32
  }
  func.func @transform_8(%arg0: i32) -> (i32, i32) {
    %c0_i32 = arith.constant 0 : i32
    %c0_i32_0 = arith.constant 0 : i32
    return %arg0, %c0_i32 : i32, i32
  }
}

module attributes {stable_mosaic.version = 11 : i64} {
  func.func @_latent_variation_kernel(%arg0: i32, %arg1: memref<8x16xf32, #tpu.memory_space<vmem>>, %arg2: memref<8x16xf32, #tpu.memory_space<vmem>>, %arg3: memref<16x64xf32, #tpu.memory_space<vmem>>, %arg4: memref<16x64xf32, #tpu.memory_space<vmem>>, %arg5: memref<1x64xf32, #tpu.memory_space<vmem>>, %arg6: memref<8x32xf32, #tpu.memory_space<vmem>>, %arg7: memref<8x32xf32, #tpu.memory_space<vmem>>, %arg8: memref<8x32xf32, #tpu.memory_space<vmem>>, %arg9: memref<8x32xf32, #tpu.memory_space<vmem>>) attributes {dimension_semantics = [#tpu.dimension_semantics<parallel>], iteration_bounds = array<i64: 1>, scalar_prefetch = 0 : i64, scratch_operands = 0 : i64, tpu.core_type = #tpu.core_type<tc>, window_params = [{transform_indices = @transform_0, window_bounds = array<i64: 8, 16>}, {transform_indices = @transform_1, window_bounds = array<i64: 8, 16>}, {pipeline_mode = #tpu.pipeline_mode<synchronous>, transform_indices = @transform_2, window_bounds = array<i64: 16, 64>}, {pipeline_mode = #tpu.pipeline_mode<synchronous>, transform_indices = @transform_3, window_bounds = array<i64: 16, 64>}, {pipeline_mode = #tpu.pipeline_mode<synchronous>, transform_indices = @transform_4, window_bounds = array<i64: 1, 64>}, {transform_indices = @transform_5, window_bounds = array<i64: 8, 32>}, {transform_indices = @transform_6, window_bounds = array<i64: 8, 32>}, {transform_indices = @transform_7, window_bounds = array<i64: 8, 32>}, {transform_indices = @transform_8, window_bounds = array<i64: 8, 32>}]} {
    %c0 = arith.constant 0 : index
    %c0_0 = arith.constant 0 : index
    %0 = vector.load %arg1[%c0, %c0_0] : memref<8x16xf32, #tpu.memory_space<vmem>>, vector<8x16xf32>
    %c0_1 = arith.constant 0 : index
    %c0_2 = arith.constant 0 : index
    %1 = vector.load %arg3[%c0_1, %c0_2] : memref<16x64xf32, #tpu.memory_space<vmem>>, vector<16x64xf32>
    %cst = arith.constant dense<0.000000e+00> : vector<8x64xf32>
    %2 = tpu.matmul %0, %1, %cst {dimension_numbers = #tpu.dot_dimension_numbers<[1], [0], [0], [1], [0, 0, 1, 1], [], []>} : vector<8x16xf32>, vector<16x64xf32>, vector<8x64xf32> -> vector<8x64xf32>
    %c0_3 = arith.constant 0 : index
    %c0_4 = arith.constant 0 : index
    %3 = vector.load %arg2[%c0_3, %c0_4] : memref<8x16xf32, #tpu.memory_space<vmem>>, vector<8x16xf32>
    %c0_5 = arith.constant 0 : index
    %c0_6 = arith.constant 0 : index
    %4 = vector.load %arg4[%c0_5, %c0_6] : memref<16x64xf32, #tpu.memory_space<vmem>>, vector<16x64xf32>
    %cst_7 = arith.constant dense<0.000000e+00> : vector<8x64xf32>
    %5 = tpu.matmul %3, %4, %cst_7 {dimension_numbers = #tpu.dot_dimension_numbers<[1], [0], [0], [1], [0, 0, 1, 1], [], []>} : vector<8x16xf32>, vector<16x64xf32>, vector<8x64xf32> -> vector<8x64xf32>
    %6 = arith.addf %2, %5 : vector<8x64xf32>
    %c0_8 = arith.constant 0 : index
    %c0_9 = arith.constant 0 : index
    %7 = vector.load %arg5[%c0_8, %c0_9] : memref<1x64xf32, #tpu.memory_space<vmem>>, vector<1x64xf32>
    %8 = vector.broadcast %7 : vector<1x64xf32> to vector<8x64xf32>
    %9 = arith.addf %6, %8 : vector<8x64xf32>
    %10 = vector.extract_strided_slice %9 {offsets = [0, 0], sizes = [8, 32], strides = [1, 1]} : vector<8x64xf32> to vector<8x32xf32>
    %11 = vector.extract_strided_slice %9 {offsets = [0, 32], sizes = [8, 32], strides = [1, 1]} : vector<8x64xf32> to vector<8x32xf32>
    %c0_10 = arith.constant 0 : index
    %c0_11 = arith.constant 0 : index
    %12 = vector.load %arg8[%c0_10, %c0_11] : memref<8x32xf32, #tpu.memory_space<vmem>>, vector<8x32xf32>
    tpu.vector_store %arg8[%c0_10, %c0_11], %10 {strides = array<i32>} : memref<8x32xf32, #tpu.memory_space<vmem>>, vector<8x32xf32>,
    %c0_12 = arith.constant 0 : index
    %c0_13 = arith.constant 0 : index
    %13 = vector.load %arg9[%c0_12, %c0_13] : memref<8x32xf32, #tpu.memory_space<vmem>>, vector<8x32xf32>
    tpu.vector_store %arg9[%c0_12, %c0_13], %11 {strides = array<i32>} : memref<8x32xf32, #tpu.memory_space<vmem>>, vector<8x32xf32>,
    %c0_14 = arith.constant 0 : index
    %c0_15 = arith.constant 0 : index
    %14 = vector.load %arg6[%c0_14, %c0_15] : memref<8x32xf32, #tpu.memory_space<vmem>>, vector<8x32xf32>
    %cst_16 = arith.constant 5.000000e-01 : f32
    %15 = vector.broadcast %cst_16 : f32 to vector<8x32xf32>
    %16 = arith.mulf %15, %11 : vector<8x32xf32>
    %17 = math.exp %16 : vector<8x32xf32>
    %18 = arith.mulf %14, %17 : vector<8x32xf32>
    %19 = arith.addf %18, %10 : vector<8x32xf32>
    %c0_17 = arith.constant 0 : index
    %c0_18 = arith.constant 0 : index
    %20 = vector.load %arg7[%c0_17, %c0_18] : memref<8x32xf32, #tpu.memory_space<vmem>>, vector<8x32xf32>
    tpu.vector_store %arg7[%c0_17, %c0_18], %19 {strides = array<i32>} : memref<8x32xf32, #tpu.memory_space<vmem>>, vector<8x32xf32>,
    return
  }
  func.func @transform_0(%arg0: i32) -> (i32, i32) {
    %c0_i32 = arith.constant 0 : i32
    %c0_i32_0 = arith.constant 0 : i32
    return %arg0, %c0_i32 : i32, i32
  }
  func.func @transform_1(%arg0: i32) -> (i32, i32) {
    %c0_i32 = arith.constant 0 : i32
    %c0_i32_0 = arith.constant 0 : i32
    return %arg0, %c0_i32 : i32, i32
  }
  func.func @transform_2(%arg0: i32) -> (i32, i32) {
    %c0_i32 = arith.constant 0 : i32
    %c0_i32_0 = arith.constant 0 : i32
    %c0_i32_1 = arith.constant 0 : i32
    return %c0_i32, %c0_i32_0 : i32, i32
  }
  func.func @transform_3(%arg0: i32) -> (i32, i32) {
    %c0_i32 = arith.constant 0 : i32
    %c0_i32_0 = arith.constant 0 : i32
    %c0_i32_1 = arith.constant 0 : i32
    return %c0_i32, %c0_i32_0 : i32, i32
  }
  func.func @transform_4(%arg0: i32) -> (i32, i32) {
    %c0_i32 = arith.constant 0 : i32
    %c0_i32_0 = arith.constant 0 : i32
    %c0_i32_1 = arith.constant 0 : i32
    return %c0_i32, %c0_i32_0 : i32, i32
  }
  func.func @transform_5(%arg0: i32) -> (i32, i32) {
    %c0_i32 = arith.constant 0 : i32
    %c0_i32_0 = arith.constant 0 : i32
    return %arg0, %c0_i32 : i32, i32
  }
  func.func @transform_6(%arg0: i32) -> (i32, i32) {
    %c0_i32 = arith.constant 0 : i32
    %c0_i32_0 = arith.constant 0 : i32
    return %arg0, %c0_i32 : i32, i32
  }
  func.func @transform_7(%arg0: i32) -> (i32, i32) {
    %c0_i32 = arith.constant 0 : i32
    %c0_i32_0 = arith.constant 0 : i32
    return %arg0, %c0_i32 : i32, i32
  }
  func.func @transform_8(%arg0: i32) -> (i32, i32) {
    %c0_i32 = arith.constant 0 : i32
    %c0_i32_0 = arith.constant 0 : i32
    return %arg0, %c0_i32 : i32, i32
  }
}

</mosaic_0001>

<bundles_post_ra>
// kernel: tpu_custom_call.1
= control target key start
LH: loop header
LB: loop body
LE: loop exit
PB: predicated region body
PF: predicated region fallthrough
CT: control target
= control target key end

     0   :  { %14 = vsyncpa [#allocation3], 0  ;;  %s661_s0 = inlined_call_operand.hbm [shape: f32[8,16], index: 0, kind: input, shape index: {}]   ;;  %s662_s1 = inlined_call_operand.hbm [shape: f32[8,16], index: 1, kind: input, shape index: {}]   ;;  %s663_s2 = inlined_call_operand.hbm [shape: f32[16,64], index: 2, kind: input, shape index: {}]   ;;  %s664_s3 = inlined_call_operand.hbm [shape: f32[16,64], index: 3, kind: input, shape index: {}]   ;;  %s665_s4 = inlined_call_operand.vmem [shape: f32[1,64], index: 4, kind: input, shape index: {}]   ;;  %s666_s5 = inlined_call_operand.vmem [shape: f32[8,32], index: 5, kind: input, shape index: {}]   ;;  %s667_s6 = inlined_call_operand.hbm [shape: f32[8,32], index: 6, kind: output, shape index: {0}]   ;;  %s668_s7 = inlined_call_operand.hbm [shape: f32[8,32], index: 7, kind: output, shape index: {1}]   ;;  %s669_s8 = inlined_call_operand.hbm [shape: f32[8,32], index: 8, kind: output, shape index: {2}]  }
   0x1   :  { %15 = vsyncpa [#allocation6], 0 }
   0x2   :  { %16 = vsyncpa [#allocation9], 0 }
   0x3   :  { %17 = vsyncpa [#allocation4], 0 }
   0x4   :  { %18 = vsyncpa [#allocation12], 0  ;;  %s510_s27 = smov [#allocation5]   ;;  %s511_s29 = smov [#allocation2]  }
   0x5   :  { %s35_s28 = sshll.u32 %s510_s27, 4  ;;  %s25_s30 = sshll.u32 %s511_s29, 4  ;;  %s36_s28 = int_to_ptr.vmem [resolvable:$true] %s35_s28  ;;  %s26_s30 = int_to_ptr.vmem [resolvable:$true] %s25_s30 }
   0x6   :  { %s346_s11 = scalar_lea.hbm %s662_s1, 128 }
   0x7   :  { %p347_p0 = scmp.ne.s32.totalorder %s662_s1, %s346_s11  ;;  %p350_p1 = scmp.lt.u32.totalorder %s346_s11, %s662_s1 }
   0x9   :  { %p352_p2 = pnand %p350_p1, %p347_p0 }
   0xb   :  { %355 = shalt.err (!%p352_p2)
}
   0xc   :  { %s356_s16 = scalar_lea.vmem %s36_s28, 128  ;;  %p361_p4 = scmp.lt.s32.totalorder %s36_s28, %s36_s28 }
   0xd   :  { %p357_p3 = scmp.ne.s32.totalorder %s36_s28, %s356_s16  ;;  %p362_p5 = scmp.lt.s32.totalorder %s356_s16, %s356_s16 }
   0xf   :  { %p363_p6 = por %p362_p5, %p361_p4 }
  0x11   :  { %p364_p7 = pnand %p363_p6, %p357_p3 }
  0x13   :  { %367 = shalt.err (!%p364_p7)
}
  0x14   :  { %38 = dma.hbm_to_vmem [thread:$0]  %s662_s1, 128, %s36_s28, [#allocation6]  }
  0x15   :  { %s368_s21 = scalar_lea.hbm %s661_s0, 128 }
  0x16   :  { %p369_p8 = scmp.ne.s32.totalorder %s661_s0, %s368_s21  ;;  %p372_p9 = scmp.lt.u32.totalorder %s368_s21, %s661_s0 }
  0x18   :  { %p374_p10 = pnand %p372_p9, %p369_p8 }
  0x1a   :  { %377 = shalt.err (!%p374_p10)
}
  0x1b   :  { %s378_s26 = scalar_lea.vmem %s26_s30, 128  ;;  %p383_p12 = scmp.lt.s32.totalorder %s26_s30, %s26_s30 }
  0x1c   :  { %p379_p11 = scmp.ne.s32.totalorder %s26_s30, %s378_s26  ;;  %p384_p13 = scmp.lt.s32.totalorder %s378_s26, %s378_s26 }
  0x1e   :  { %p385_p0 = por %p384_p13, %p383_p12 }
  0x20   :  { %p386_p1 = pnand %p385_p0, %p379_p11 }
  0x22   :  { %389 = shalt.err (!%p386_p1)
}
  0x23   :  { %28 = dma.hbm_to_vmem [thread:$0]  %s661_s0, 128, %s26_s30, [#allocation3]  }
  0x24   :  { %s512_s28 = smov [#allocation7]   ;;  %s390_s11 = scalar_lea.hbm %s663_s2, 256 }
  0x25   :  { %s44_s29 = sshll.u32 %s512_s28, 4  ;;  %p391_p2 = scmp.ne.s32.totalorder %s663_s2, %s390_s11  ;;  %s45_s29 = int_to_ptr.vmem [resolvable:$true] %s44_s29 }
  0x26   :  { %p394_p3 = scmp.lt.u32.totalorder %s390_s11, %s663_s2 }
  0x28   :  { %p396_p4 = pnand %p394_p3, %p391_p2 }
  0x2a   :  { %399 = shalt.err (!%p396_p4)
}
  0x2b   :  { %s400_s16 = scalar_lea.vmem %s45_s29, 256  ;;  %p405_p6 = scmp.lt.s32.totalorder %s45_s29, %s45_s29 }
  0x2c   :  { %p401_p5 = scmp.ne.s32.totalorder %s45_s29, %s400_s16  ;;  %p406_p7 = scmp.lt.s32.totalorder %s400_s16, %s400_s16 }
  0x2e   :  { %p407_p8 = por %p406_p7, %p405_p6 }
  0x30   :  { %p408_p9 = pnand %p407_p8, %p401_p5 }
  0x32   :  { %411 = shalt.err (!%p408_p9)
}
  0x33   :  { %s513_s0 = smov 128   ;;  %s514_s30 = smov 8  }
  0x34   :  { %50 = dma.hbm_to_vmem [thread:$0]  %s663_s2, 256, %s45_s29, [#allocation6], %s513_s0, %s513_s0, %s514_s30  }
  0x35   :  { %s515_s19 = smov [#allocation8]   ;;  %s412_s23 = scalar_lea.hbm %s664_s3, 256 }
  0x36   :  { %s56_s20 = sshll.u32 %s515_s19, 4  ;;  %p413_p10 = scmp.ne.s32.totalorder %s664_s3, %s412_s23  ;;  %s57_s20 = int_to_ptr.vmem [resolvable:$true] %s56_s20 }
  0x37   :  { %p416_p11 = scmp.lt.u32.totalorder %s412_s23, %s664_s3 }
  0x39   :  { %p418_p12 = pnand %p416_p11, %p413_p10 }
  0x3b   :  { %421 = shalt.err (!%p418_p12)
}
  0x3c   :  { %s422_s27 = scalar_lea.vmem %s57_s20, 256  ;;  %p427_p0 = scmp.lt.s32.totalorder %s57_s20, %s57_s20 }
  0x3d   :  { %p423_p13 = scmp.ne.s32.totalorder %s57_s20, %s422_s27  ;;  %p428_p1 = scmp.lt.s32.totalorder %s422_s27, %s422_s27 }
  0x3f   :  { %p429_p2 = por %p428_p1, %p427_p0 }
  0x41   :  { %p430_p3 = pnand %p429_p2, %p423_p13 }
  0x43   :  { %433 = shalt.err (!%p430_p3)
}
  0x44   :  { %62 = dma.hbm_to_vmem [thread:$0]  %s664_s3, 256, %s57_s20, [#allocation9], %s513_s0, %s513_s0, %s514_s30  }
  0x45   :  { %500 = dma.done.wait [#allocation3], 128  }
  0x46   :  { %501 = vsyncadd [#allocation3], 4294967168 }
  0x47   :  { %502 = dma.done.wait [#allocation6], 384  }
  0x48   :  { %503 = vsyncadd [#allocation6], 4294966912 }
  0x49   :  { %504 = dma.done.wait [#allocation9], 256  }
  0x4a   :  { %505 = vsyncadd [#allocation9], 4294967040  ;;  %v516_v0 = vmov 0.0|0.0   ;;  %vm517_vm0 = vmmov 0   ;;  %v518_v1 = vmov 0.0   ;;  %v83_v2 = vld [vmem:[#allocation8] sm:$0xff] }
  0x4b   :  { %325 = vmatprep.subr.bf16.mxu0 %v516_v0  ;;  %328 = vmatprep.subr.bf16.mxu1 %v516_v0  ;;  %v84_v3 = vld [vmem:[#allocation8 + $0x8] sm:$0xff]  ;;  %v80_v4 = vld [vmem:[#allocation7] sm:$0xff]  ;;  %v81_v6 = vld [vmem:[#allocation7 + $0x8] sm:$0xff]  ;;  %vm85_vm1 = vcmask 130048   ;;  %vm240_vm2 = vcmask 261120   ;;  %s519_s9 = smov [#allocation11]  }
  0x4c   :  { %315 = vmatprep.mubr.msk.f32.mxu0 %vm517_vm0, %v518_v1  ;;  %322 = vmatprep.mubr.msk.f32.mxu1 %vm517_vm0, %v518_v1  ;;  %v326_v5 = vpack.c.bf16 %v84_v3, %v83_v2  ;;  %v329_v7 = vpack.c.bf16 %v81_v6, %v80_v4  ;;  %v82_v8 = vld [vmem:[#allocation5] sm:$0xff]  ;;  %v79_v9 = vld [vmem:[#allocation2] sm:$0xff]  ;;  %s274_s10 = sshll.u32 %s519_s9, 4  ;;  %s275_s10 = int_to_ptr.vmem [resolvable:$true] %s274_s10 }
  0x4d   :  { %v304_v12 = vld [vmem:[%s665_s4] ss:$0 sm:$0xff]  ;;  %s434_s11 = scalar_lea.vmem %s275_s10, 128  ;;  %p439_p5 = scmp.lt.s32.totalorder %s275_s10, %s275_s10 }
  0x4e   :  { %327 = vmatpush3.bf16.msra.mxu0 %v326_v5  ;;  %330 = vmatpush3.bf16.msra.mxu1 %v329_v7  ;;  %p435_p4 = scmp.ne.s32.totalorder %s275_s10, %s434_s11  ;;  %p440_p6 = scmp.lt.s32.totalorder %s434_s11, %s434_s11 }
  0x50   :  { %p441_p7 = por %p440_p6, %p439_p5 }
  0x51   :  { %316 = vmatmul.mubr.msk.f32.vlgmr.msra.gmra.mrb[0].mxu0 %vm85_vm1, %v82_v8  ;;  %323 = vmatmul.mubr.msk.f32.vlgmr.msra.gmra.mrb[0].mxu1 %vm85_vm1, %v79_v9 }
  0x52   :  { %p442_p8 = pnand %p441_p7, %p435_p4 }
 0x124   :  { %v155_v10 = vpop.f32.mrb[0].mxu0  ;;  %v228_v11 = vpop.f32.mrb[0].mxu1 }
 0x125   :  { %v317_v13 = vpop.f32.mrb[1].mxu0  ;;  %v229_v14 = vadd.f32 %v228_v11, %v155_v10  ;;  %v324_v15 = vpop.f32.mrb[1].mxu1 }
 0x127   :  { %v239_v16 = vadd.f32 %v304_v12, %v229_v14 }
 0x129   :  { %v248_v17 = vmul.f32 0.5, %v239_v16  ;;  %241 = vst.msk [vmem:[#allocation11] sm:$0xff] %vm240_vm2, %v239_v16 }
 0x12b   :  { %v249_v18 = vmul.f32 1.442695, %v248_v17 }
 0x12d   :  { %344 = vpow2.f32 %v249_v18 }
 0x12e   :  { %445 = shalt.err (!%p442_p8)
}
 0x12f   :  { %s446_s13 = scalar_lea.hbm %s668_s7, 128 }
 0x130   :  { %p447_p9 = scmp.ne.s32.totalorder %s668_s7, %s446_s13  ;;  %p450_p10 = scmp.lt.u32.totalorder %s446_s13, %s668_s7 }
 0x132   :  { %p452_p11 = pnand %p450_p10, %p447_p9 }
 0x134   :  { %455 = shalt.err (!%p452_p11)
}
 0x135   :  { %277 = dma.vmem_to_hbm [thread:$0]  %s275_s10, 128, %s668_s7, [#allocation12]   ;;  %v247_v20 = vld [vmem:[%s666_s5] sm:$0xff] }
 0x136   :  { %s520_s18 = smov 96   ;;  %s521_s21 = smov [#allocation10]  }
 0x137   :  { %v345_v19 = vpop.eup %344  ;;  %s264_s22 = sshll.u32 %s521_s21, 4  ;;  %s522_s23 = smov [#allocation13]   ;;  %s265_s22 = int_to_ptr.vmem [resolvable:$true] %s264_s22 }
 0x138   :  { %252 = vrot.lane.b32.xlu0 %v345_v19, %s520_s18  ;;  %s284_s24 = sshll.u32 %s522_s23, 4  ;;  %s456_s7 = scalar_lea.vmem %s265_s22, 128  ;;  %s285_s24 = int_to_ptr.vmem [resolvable:$true] %s284_s24 }
 0x139   :  { %p457_p12 = scmp.ne.s32.totalorder %s265_s22, %s456_s7  ;;  %p461_p13 = scmp.lt.s32.totalorder %s265_s22, %s265_s22 }
 0x13a   :  { %p462_p0 = scmp.lt.s32.totalorder %s456_s7, %s456_s7 }
 0x13c   :  { %243 = vrot.lane.b32.xlu0 %v239_v16, %s520_s18  ;;  %p463_p1 = por %p462_p0, %p461_p13 }
 0x13e   :  { %p464_p2 = pnand %p463_p1, %p457_p12 }
 0x1aa   :  { %v253_v21 = vpop.permute.xlu0 %252 }
 0x1ab   :  { %v255_v22 = vmul.f32 %v253_v21, %v247_v20 }
 0x1ad   :  { %v256_v23 = vadd.f32 %v255_v22, %v239_v16 }
 0x1ae   :  { %v244_v24 = vpop.permute.xlu0 %243 }
 0x1af   :  { %246 = vst.msk [vmem:[#allocation13] sm:$0xff] %vm240_vm2, %v244_v24  ;;  %257 = vst.msk [vmem:[#allocation10] sm:$0xff] %vm240_vm2, %v256_v23 }
 0x1b0   :  { %467 = shalt.err (!%p464_p2)
}
 0x1b1   :  { %s468_s26 = scalar_lea.hbm %s667_s6, 128 }
 0x1b2   :  { %p469_p3 = scmp.ne.s32.totalorder %s667_s6, %s468_s26  ;;  %p472_p4 = scmp.lt.u32.totalorder %s468_s26, %s667_s6 }
 0x1b4   :  { %p474_p5 = pnand %p472_p4, %p469_p3 }
 0x1b6   :  { %477 = shalt.err (!%p474_p5)
}
 0x1b7   :  { %267 = dma.vmem_to_hbm [thread:$0]  %s265_s22, 128, %s667_s6, [#allocation4]  }
 0x1b8   :  { %s478_s9 = scalar_lea.vmem %s285_s24, 128  ;;  %p483_p7 = scmp.lt.s32.totalorder %s285_s24, %s285_s24 }
 0x1b9   :  { %p479_p6 = scmp.ne.s32.totalorder %s285_s24, %s478_s9  ;;  %p484_p8 = scmp.lt.s32.totalorder %s478_s9, %s478_s9 }
 0x1bb   :  { %p485_p9 = por %p484_p8, %p483_p7 }
 0x1bd   :  { %p486_p10 = pnand %p485_p9, %p479_p6 }
 0x1bf   :  { %489 = shalt.err (!%p486_p10)
}
 0x1c0   :  { %s490_s4 = scalar_lea.hbm %s669_s8, 128 }
 0x1c1   :  { %p491_p11 = scmp.ne.s32.totalorder %s669_s8, %s490_s4  ;;  %p494_p12 = scmp.lt.u32.totalorder %s490_s4, %s669_s8 }
 0x1c3   :  { %p496_p13 = pnand %p494_p12, %p491_p11 }
 0x1c5   :  { %499 = shalt.err (!%p496_p13)
}
 0x1c6   :  { %287 = dma.vmem_to_hbm [thread:$0]  %s285_s24, 128, %s669_s8, [#allocation12]  }
 0x1c7   :  { %506 = dma.done.wait [#allocation4], 128  }
 0x1c8   :  { %507 = vsyncadd [#allocation4], 4294967168 }
 0x1c9   :  { %508 = dma.done.wait [#allocation12], 256  }
 0x1ca   :  { %509 = vsyncadd [#allocation12], 4294967040 }
 0x1cb   :  { %297 = vsyncpa [#allocation3], 1 }
 0x1cc   :  { %298 = vsyncpa [#allocation6], 1 }
 0x1cd   :  { %299 = vsyncpa [#allocation9], 1 }
 0x1ce   :  { %300 = vsyncpa [#allocation4], 1 }
 0x1cf   :  { %301 = vsyncpa [#allocation12], 1 }

// kernel: tpu_custom_call.1
= control target key start
LH: loop header
LB: loop body
LE: loop exit
PB: predicated region body
PF: predicated region fallthrough
CT: control target
= control target key end

     0   :  { %14 = vsyncpa [#allocation3], 0  ;;  %s661_s0 = inlined_call_operand.hbm [shape: f32[8,16], index: 0, kind: input, shape index: {}]   ;;  %s662_s1 = inlined_call_operand.hbm [shape: f32[8,16], index: 1, kind: input, shape index: {}]   ;;  %s663_s2 = inlined_call_operand.hbm [shape: f32[16,64], index: 2, kind: input, shape index: {}]   ;;  %s664_s3 = inlined_call_operand.hbm [shape: f32[16,64], index: 3, kind: input, shape index: {}]   ;;  %s665_s4 = inlined_call_operand.vmem [shape: f32[1,64], index: 4, kind: input, shape index: {}]   ;;  %s666_s5 = inlined_call_operand.vmem [shape: f32[8,32], index: 5, kind: input, shape index: {}]   ;;  %s667_s6 = inlined_call_operand.hbm [shape: f32[8,32], index: 6, kind: output, shape index: {0}]   ;;  %s668_s7 = inlined_call_operand.hbm [shape: f32[8,32], index: 7, kind: output, shape index: {1}]   ;;  %s669_s8 = inlined_call_operand.hbm [shape: f32[8,32], index: 8, kind: output, shape index: {2}]  }
   0x1   :  { %15 = vsyncpa [#allocation6], 0 }
   0x2   :  { %16 = vsyncpa [#allocation9], 0 }
   0x3   :  { %17 = vsyncpa [#allocation4], 0 }
   0x4   :  { %18 = vsyncpa [#allocation12], 0  ;;  %s510_s27 = smov [#allocation5]   ;;  %s511_s29 = smov [#allocation2]  }
   0x5   :  { %s35_s28 = sshll.u32 %s510_s27, 4  ;;  %s25_s30 = sshll.u32 %s511_s29, 4  ;;  %s36_s28 = int_to_ptr.vmem [resolvable:$true] %s35_s28  ;;  %s26_s30 = int_to_ptr.vmem [resolvable:$true] %s25_s30 }
   0x6   :  { %s346_s11 = scalar_lea.hbm %s662_s1, 128 }
   0x7   :  { %p347_p0 = scmp.ne.s32.totalorder %s662_s1, %s346_s11  ;;  %p350_p1 = scmp.lt.u32.totalorder %s346_s11, %s662_s1 }
   0x9   :  { %p352_p2 = pnand %p350_p1, %p347_p0 }
   0xb   :  { %355 = shalt.err (!%p352_p2)
}
   0xc   :  { %s356_s16 = scalar_lea.vmem %s36_s28, 128  ;;  %p361_p4 = scmp.lt.s32.totalorder %s36_s28, %s36_s28 }
   0xd   :  { %p357_p3 = scmp.ne.s32.totalorder %s36_s28, %s356_s16  ;;  %p362_p5 = scmp.lt.s32.totalorder %s356_s16, %s356_s16 }
   0xf   :  { %p363_p6 = por %p362_p5, %p361_p4 }
  0x11   :  { %p364_p7 = pnand %p363_p6, %p357_p3 }
  0x13   :  { %367 = shalt.err (!%p364_p7)
}
  0x14   :  { %38 = dma.hbm_to_vmem [thread:$0]  %s662_s1, 128, %s36_s28, [#allocation6]  }
  0x15   :  { %s368_s21 = scalar_lea.hbm %s661_s0, 128 }
  0x16   :  { %p369_p8 = scmp.ne.s32.totalorder %s661_s0, %s368_s21  ;;  %p372_p9 = scmp.lt.u32.totalorder %s368_s21, %s661_s0 }
  0x18   :  { %p374_p10 = pnand %p372_p9, %p369_p8 }
  0x1a   :  { %377 = shalt.err (!%p374_p10)
}
  0x1b   :  { %s378_s26 = scalar_lea.vmem %s26_s30, 128  ;;  %p383_p12 = scmp.lt.s32.totalorder %s26_s30, %s26_s30 }
  0x1c   :  { %p379_p11 = scmp.ne.s32.totalorder %s26_s30, %s378_s26  ;;  %p384_p13 = scmp.lt.s32.totalorder %s378_s26, %s378_s26 }
  0x1e   :  { %p385_p0 = por %p384_p13, %p383_p12 }
  0x20   :  { %p386_p1 = pnand %p385_p0, %p379_p11 }
  0x22   :  { %389 = shalt.err (!%p386_p1)
}
  0x23   :  { %28 = dma.hbm_to_vmem [thread:$0]  %s661_s0, 128, %s26_s30, [#allocation3]  }
  0x24   :  { %s512_s28 = smov [#allocation7]   ;;  %s390_s11 = scalar_lea.hbm %s663_s2, 256 }
  0x25   :  { %s44_s29 = sshll.u32 %s512_s28, 4  ;;  %p391_p2 = scmp.ne.s32.totalorder %s663_s2, %s390_s11  ;;  %s45_s29 = int_to_ptr.vmem [resolvable:$true] %s44_s29 }
  0x26   :  { %p394_p3 = scmp.lt.u32.totalorder %s390_s11, %s663_s2 }
  0x28   :  { %p396_p4 = pnand %p394_p3, %p391_p2 }
  0x2a   :  { %399 = shalt.err (!%p396_p4)
}
  0x2b   :  { %s400_s16 = scalar_lea.vmem %s45_s29, 256  ;;  %p405_p6 = scmp.lt.s32.totalorder %s45_s29, %s45_s29 }
  0x2c   :  { %p401_p5 = scmp.ne.s32.totalorder %s45_s29, %s400_s16  ;;  %p406_p7 = scmp.lt.s32.totalorder %s400_s16, %s400_s16 }
  0x2e   :  { %p407_p8 = por %p406_p7, %p405_p6 }
  0x30   :  { %p408_p9 = pnand %p407_p8, %p401_p5 }
  0x32   :  { %411 = shalt.err (!%p408_p9)
}
  0x33   :  { %s513_s0 = smov 128   ;;  %s514_s30 = smov 8  }
  0x34   :  { %50 = dma.hbm_to_vmem [thread:$0]  %s663_s2, 256, %s45_s29, [#allocation6], %s513_s0, %s513_s0, %s514_s30  }
  0x35   :  { %s515_s19 = smov [#allocation8]   ;;  %s412_s23 = scalar_lea.hbm %s664_s3, 256 }
  0x36   :  { %s56_s20 = sshll.u32 %s515_s19, 4  ;;  %p413_p10 = scmp.ne.s32.totalorder %s664_s3, %s412_s23  ;;  %s57_s20 = int_to_ptr.vmem [resolvable:$true] %s56_s20 }
  0x37   :  { %p416_p11 = scmp.lt.u32.totalorder %s412_s23, %s664_s3 }
  0x39   :  { %p418_p12 = pnand %p416_p11, %p413_p10 }
  0x3b   :  { %421 = shalt.err (!%p418_p12)
}
  0x3c   :  { %s422_s27 = scalar_lea.vmem %s57_s20, 256  ;;  %p427_p0 = scmp.lt.s32.totalorder %s57_s20, %s57_s20 }
  0x3d   :  { %p423_p13 = scmp.ne.s32.totalorder %s57_s20, %s422_s27  ;;  %p428_p1 = scmp.lt.s32.totalorder %s422_s27, %s422_s27 }
  0x3f   :  { %p429_p2 = por %p428_p1, %p427_p0 }
  0x41   :  { %p430_p3 = pnand %p429_p2, %p423_p13 }
  0x43   :  { %433 = shalt.err (!%p430_p3)
}
  0x44   :  { %62 = dma.hbm_to_vmem [thread:$0]  %s664_s3, 256, %s57_s20, [#allocation9], %s513_s0, %s513_s0, %s514_s30  }
  0x45   :  { %500 = dma.done.wait [#allocation3], 128  }
  0x46   :  { %501 = vsyncadd [#allocation3], 4294967168 }
  0x47   :  { %502 = dma.done.wait [#allocation6], 384  }
  0x48   :  { %503 = vsyncadd [#allocation6], 4294966912 }
  0x49   :  { %504 = dma.done.wait [#allocation9], 256  }
  0x4a   :  { %505 = vsyncadd [#allocation9], 4294967040  ;;  %v516_v0 = vmov 0.0|0.0   ;;  %vm517_vm0 = vmmov 0   ;;  %v518_v1 = vmov 0.0   ;;  %v83_v2 = vld [vmem:[#allocation8] sm:$0xff] }
  0x4b   :  { %325 = vmatprep.subr.bf16.mxu0 %v516_v0  ;;  %328 = vmatprep.subr.bf16.mxu1 %v516_v0  ;;  %v84_v3 = vld [vmem:[#allocation8 + $0x8] sm:$0xff]  ;;  %v80_v4 = vld [vmem:[#allocation7] sm:$0xff]  ;;  %v81_v6 = vld [vmem:[#allocation7 + $0x8] sm:$0xff]  ;;  %vm85_vm1 = vcmask 130048   ;;  %vm240_vm2 = vcmask 261120   ;;  %s519_s9 = smov [#allocation11]  }
  0x4c   :  { %315 = vmatprep.mubr.msk.f32.mxu0 %vm517_vm0, %v518_v1  ;;  %322 = vmatprep.mubr.msk.f32.mxu1 %vm517_vm0, %v518_v1  ;;  %v326_v5 = vpack.c.bf16 %v84_v3, %v83_v2  ;;  %v329_v7 = vpack.c.bf16 %v81_v6, %v80_v4  ;;  %v82_v8 = vld [vmem:[#allocation5] sm:$0xff]  ;;  %v79_v9 = vld [vmem:[#allocation2] sm:$0xff]  ;;  %s274_s10 = sshll.u32 %s519_s9, 4  ;;  %s275_s10 = int_to_ptr.vmem [resolvable:$true] %s274_s10 }
  0x4d   :  { %v304_v12 = vld [vmem:[%s665_s4] ss:$0 sm:$0xff]  ;;  %s434_s11 = scalar_lea.vmem %s275_s10, 128  ;;  %p439_p5 = scmp.lt.s32.totalorder %s275_s10, %s275_s10 }
  0x4e   :  { %327 = vmatpush3.bf16.msra.mxu0 %v326_v5  ;;  %330 = vmatpush3.bf16.msra.mxu1 %v329_v7  ;;  %p435_p4 = scmp.ne.s32.totalorder %s275_s10, %s434_s11  ;;  %p440_p6 = scmp.lt.s32.totalorder %s434_s11, %s434_s11 }
  0x50   :  { %p441_p7 = por %p440_p6, %p439_p5 }
  0x51   :  { %316 = vmatmul.mubr.msk.f32.vlgmr.msra.gmra.mrb[0].mxu0 %vm85_vm1, %v82_v8  ;;  %323 = vmatmul.mubr.msk.f32.vlgmr.msra.gmra.mrb[0].mxu1 %vm85_vm1, %v79_v9 }
  0x52   :  { %p442_p8 = pnand %p441_p7, %p435_p4 }
 0x124   :  { %v155_v10 = vpop.f32.mrb[0].mxu0  ;;  %v228_v11 = vpop.f32.mrb[0].mxu1 }
 0x125   :  { %v317_v13 = vpop.f32.mrb[1].mxu0  ;;  %v229_v14 = vadd.f32 %v228_v11, %v155_v10  ;;  %v324_v15 = vpop.f32.mrb[1].mxu1 }
 0x127   :  { %v239_v16 = vadd.f32 %v304_v12, %v229_v14 }
 0x129   :  { %v248_v17 = vmul.f32 0.5, %v239_v16  ;;  %241 = vst.msk [vmem:[#allocation11] sm:$0xff] %vm240_vm2, %v239_v16 }
 0x12b   :  { %v249_v18 = vmul.f32 1.442695, %v248_v17 }
 0x12d   :  { %344 = vpow2.f32 %v249_v18 }
 0x12e   :  { %445 = shalt.err (!%p442_p8)
}
 0x12f   :  { %s446_s13 = scalar_lea.hbm %s668_s7, 128 }
 0x130   :  { %p447_p9 = scmp.ne.s32.totalorder %s668_s7, %s446_s13  ;;  %p450_p10 = scmp.lt.u32.totalorder %s446_s13, %s668_s7 }
 0x132   :  { %p452_p11 = pnand %p450_p10, %p447_p9 }
 0x134   :  { %455 = shalt.err (!%p452_p11)
}
 0x135   :  { %277 = dma.vmem_to_hbm [thread:$0]  %s275_s10, 128, %s668_s7, [#allocation12]   ;;  %v247_v20 = vld [vmem:[%s666_s5] sm:$0xff] }
 0x136   :  { %s520_s18 = smov 96   ;;  %s521_s21 = smov [#allocation10]  }
 0x137   :  { %v345_v19 = vpop.eup %344  ;;  %s264_s22 = sshll.u32 %s521_s21, 4  ;;  %s522_s23 = smov [#allocation13]   ;;  %s265_s22 = int_to_ptr.vmem [resolvable:$true] %s264_s22 }
 0x138   :  { %252 = vrot.lane.b32.xlu0 %v345_v19, %s520_s18  ;;  %s284_s24 = sshll.u32 %s522_s23, 4  ;;  %s456_s7 = scalar_lea.vmem %s265_s22, 128  ;;  %s285_s24 = int_to_ptr.vmem [resolvable:$true] %s284_s24 }
 0x139   :  { %p457_p12 = scmp.ne.s32.totalorder %s265_s22, %s456_s7  ;;  %p461_p13 = scmp.lt.s32.totalorder %s265_s22, %s265_s22 }
 0x13a   :  { %p462_p0 = scmp.lt.s32.totalorder %s456_s7, %s456_s7 }
 0x13c   :  { %243 = vrot.lane.b32.xlu0 %v239_v16, %s520_s18  ;;  %p463_p1 = por %p462_p0, %p461_p13 }
 0x13e   :  { %p464_p2 = pnand %p463_p1, %p457_p12 }
 0x1aa   :  { %v253_v21 = vpop.permute.xlu0 %252 }
 0x1ab   :  { %v255_v22 = vmul.f32 %v253_v21, %v247_v20 }
 0x1ad   :  { %v256_v23 = vadd.f32 %v255_v22, %v239_v16 }
 0x1ae   :  { %v244_v24 = vpop.permute.xlu0 %243 }
 0x1af   :  { %246 = vst.msk [vmem:[#allocation13] sm:$0xff] %vm240_vm2, %v244_v24  ;;  %257 = vst.msk [vmem:[#allocation10] sm:$0xff] %vm240_vm2, %v256_v23 }
 0x1b0   :  { %467 = shalt.err (!%p464_p2)
}
 0x1b1   :  { %s468_s26 = scalar_lea.hbm %s667_s6, 128 }
 0x1b2   :  { %p469_p3 = scmp.ne.s32.totalorder %s667_s6, %s468_s26  ;;  %p472_p4 = scmp.lt.u32.totalorder %s468_s26, %s667_s6 }
 0x1b4   :  { %p474_p5 = pnand %p472_p4, %p469_p3 }
 0x1b6   :  { %477 = shalt.err (!%p474_p5)
}
 0x1b7   :  { %267 = dma.vmem_to_hbm [thread:$0]  %s265_s22, 128, %s667_s6, [#allocation4]  }
 0x1b8   :  { %s478_s9 = scalar_lea.vmem %s285_s24, 128  ;;  %p483_p7 = scmp.lt.s32.totalorder %s285_s24, %s285_s24 }
 0x1b9   :  { %p479_p6 = scmp.ne.s32.totalorder %s285_s24, %s478_s9  ;;  %p484_p8 = scmp.lt.s32.totalorder %s478_s9, %s478_s9 }
 0x1bb   :  { %p485_p9 = por %p484_p8, %p483_p7 }
 0x1bd   :  { %p486_p10 = pnand %p485_p9, %p479_p6 }
 0x1bf   :  { %489 = shalt.err (!%p486_p10)
}
 0x1c0   :  { %s490_s4 = scalar_lea.hbm %s669_s8, 128 }
 0x1c1   :  { %p491_p11 = scmp.ne.s32.totalorder %s669_s8, %s490_s4  ;;  %p494_p12 = scmp.lt.u32.totalorder %s490_s4, %s669_s8 }
 0x1c3   :  { %p496_p13 = pnand %p494_p12, %p491_p11 }
 0x1c5   :  { %499 = shalt.err (!%p496_p13)
}
 0x1c6   :  { %287 = dma.vmem_to_hbm [thread:$0]  %s285_s24, 128, %s669_s8, [#allocation12]  }
 0x1c7   :  { %506 = dma.done.wait [#allocation4], 128  }
 0x1c8   :  { %507 = vsyncadd [#allocation4], 4294967168 }
 0x1c9   :  { %508 = dma.done.wait [#allocation12], 256  }
 0x1ca   :  { %509 = vsyncadd [#allocation12], 4294967040 }
 0x1cb   :  { %297 = vsyncpa [#allocation3], 1 }
 0x1cc   :  { %298 = vsyncpa [#allocation6], 1 }
 0x1cd   :  { %299 = vsyncpa [#allocation9], 1 }
 0x1ce   :  { %300 = vsyncpa [#allocation4], 1 }
 0x1cf   :  { %301 = vsyncpa [#allocation12], 1 }

</bundles_post_ra>
